<compile_context>
chip_gen: v7x
topology: tpu7x:2x2x1
jax: 0.10.0
libtpu: 0.0.40
codegen_flags: <defaults>
</compile_context>

<pallas_src>
import functools
import math

import numpy as np
import jax
import jax.numpy as jnp
from jax.experimental import pallas as pl
from jax.experimental.pallas import tpu as pltpu

EPS = 1e-5
LEAKY_SLOPE = 0.01
VMEM_LIMIT = 64 * 1024 * 1024


def _round_up(x, m):
    return (x + m - 1) // m * m


# ----------------------------------------------------------------------------
# Fused matmul kernel:  act((X @ W) * scale + shift [+ gamma * res])
# ----------------------------------------------------------------------------
def _matmul_kernel(*refs, act, has_res):
    if has_res:
        x_ref, w_ref, scale_ref, shift_ref, res_ref, gamma_ref, o_ref, acc_ref = refs
    else:
        x_ref, w_ref, scale_ref, shift_ref, o_ref, acc_ref = refs
        res_ref = gamma_ref = None
    k = pl.program_id(2)

    @pl.when(k == 0)
    def _():
        acc_ref[...] = jnp.zeros_like(acc_ref)

    acc_ref[...] += jnp.dot(x_ref[...], w_ref[...], preferred_element_type=jnp.float32)

    @pl.when(k == pl.num_programs(2) - 1)
    def _():
        y = acc_ref[...] * scale_ref[...] + shift_ref[...]
        if has_res:
            y = y + gamma_ref[...] * res_ref[...].astype(jnp.float32)
        if act == "relu":
            y = jnp.maximum(y, 0.0)
        elif act == "leaky":
            y = jnp.where(y >= 0.0, y, LEAKY_SLOPE * y)
        o_ref[...] = y.astype(o_ref.dtype)


def fused_matmul(x, w, scale, shift, n_out, act="none", residual=None, gamma=None):
    """x:(M,K)  w:(Kp,Np) pre-padded bf16  scale/shift:(1,Np) f32.

    Returns act((x@w)*scale + shift [+ gamma*residual]) sliced to (M, n_out), bf16.
    """
    M, K = x.shape
    Kp, Np = w.shape

    # ---- tile selection (keeps every VMEM block small; M is tiled & parallel) ---
    if M >= 256:
        tm = 256
        Mp = _round_up(M, 256)
    else:
        tm = _round_up(M, 16)
        Mp = tm
    tk = 512 if Kp % 512 == 0 else (256 if Kp % 256 == 0 else 128)
    tn = 256 if Np % 256 == 0 else 128
    grid = (Mp // tm, Np // tn, Kp // tk)

    xp = x.astype(jnp.bfloat16)
    if (Mp, Kp) != (M, K):
        xp = jnp.pad(xp, ((0, Mp - M), (0, Kp - K)))

    in_specs = [
        pl.BlockSpec((tm, tk), lambda i, j, k: (i, k)),
        pl.BlockSpec((tk, tn), lambda i, j, k: (k, j)),
        pl.BlockSpec((1, tn), lambda i, j, k: (0, j)),
        pl.BlockSpec((1, tn), lambda i, j, k: (0, j)),
    ]
    args = [xp, w, scale, shift]

    has_res = residual is not None
    if has_res:
        rp = residual.astype(jnp.bfloat16)
        rM, rN = rp.shape
        if (Mp, Np) != (rM, rN):
            rp = jnp.pad(rp, ((0, Mp - rM), (0, Np - rN)))
        g = gamma if gamma is not None else jnp.ones((1, 1), jnp.float32)
        in_specs += [
            pl.BlockSpec((tm, tn), lambda i, j, k: (i, j)),
            pl.BlockSpec((1, 1), lambda i, j, k: (0, 0)),
        ]
        args += [rp, g]

    out = pl.pallas_call(
        functools.partial(_matmul_kernel, act=act, has_res=has_res),
        out_shape=jax.ShapeDtypeStruct((Mp, Np), jnp.bfloat16),
        grid_spec=pltpu.PrefetchScalarGridSpec(
            num_scalar_prefetch=0,
            grid=grid,
            in_specs=in_specs,
            out_specs=pl.BlockSpec((tm, tn), lambda i, j, k: (i, j)),
            scratch_shapes=[pltpu.VMEM((tm, tn), jnp.float32)],
        ),
        compiler_params=pltpu.CompilerParams(
            dimension_semantics=("parallel", "parallel", "arbitrary"),
            vmem_limit_bytes=VMEM_LIMIT,
        ),
    )(*args)
    if (Mp, Np) != (M, n_out):
        out = out[:M, :n_out]
    return out


# ----------------------------------------------------------------------------
# Row-tiled elementwise 3-way max (used twice for the 3x3/s2 ceil-mode maxpool)
# ----------------------------------------------------------------------------
def _max3_kernel(a_ref, b_ref, c_ref, o_ref):
    o_ref[...] = jnp.maximum(jnp.maximum(a_ref[...], b_ref[...]), c_ref[...])


def _max3(a, b, c):
    shape = a.shape
    C = shape[-1]
    R = int(np.prod(shape[:-1]))
    a2, b2, c2 = (t.reshape(R, C) for t in (a, b, c))
    tr = min(1024, _round_up(R, 16))
    Rp = _round_up(R, tr)
    if Rp != R:
        pad = ((0, Rp - R), (0, 0))
        a2, b2, c2 = (jnp.pad(t, pad) for t in (a2, b2, c2))
    out = pl.pallas_call(
        _max3_kernel,
        out_shape=jax.ShapeDtypeStruct((Rp, C), a.dtype),
        grid=(Rp // tr,),
        in_specs=[pl.BlockSpec((tr, C), lambda i: (i, 0))] * 3,
        out_specs=pl.BlockSpec((tr, C), lambda i: (i, 0)),
        compiler_params=pltpu.CompilerParams(dimension_semantics=("parallel",)),
    )(a2, b2, c2)
    if Rp != R:
        out = out[:R]
    return out.reshape(shape)


def maxpool_3x3_s2_p1_ceil(x):
    """MaxPool2d(kernel=3, stride=2, padding=1, ceil_mode=True) on NHWC input."""
    B, H, W, C = x.shape

    def outdim(d):
        o = math.ceil((d + 2 - 3) / 2) + 1
        if (o - 1) * 2 >= d + 1:  # PyTorch: last window must not start purely in padding
            o -= 1
        return o

    Ho, Wo = outdim(H), outdim(W)
    Hp, Wp = 2 * (Ho - 1) + 3, 2 * (Wo - 1) + 3
    # input is post-ReLU (>= 0) so zero padding is equivalent to -inf padding here
    xp = jnp.pad(x, ((0, 0), (1, Hp - H - 1), (1, Wp - W - 1), (0, 0)))
    # phase 1: max over the 3 W taps
    wt = [xp[:, :, dx : dx + 2 * (Wo - 1) + 1 : 2, :] for dx in range(3)]
    t = _max3(wt[0], wt[1], wt[2])  # (B, Hp, Wo, C)
    # phase 2: max over the 3 H taps
    ht = [t[:, dy : dy + 2 * (Ho - 1) + 1 : 2, :, :] for dy in range(3)]
    return _max3(ht[0], ht[1], ht[2])  # (B, Ho, Wo, C)


# ----------------------------------------------------------------------------
# ACF attention: HW-tiled energy accumulation + softmax, fused with acf.conv2 W
# ----------------------------------------------------------------------------
def _acf_energy_kernel(q_ref, k_ref, w2_ref, m_ref, acc_ref):
    h = pl.program_id(1)

    @pl.when(h == 0)
    def _():
        acc_ref[...] = jnp.zeros_like(acc_ref)

    # energy += proj_query_chunk (Ncls, thw) @ proj_key_chunk (thw, C)
    acc_ref[...] += jnp.dot(q_ref[0], k_ref[0], preferred_element_type=jnp.float32)

    @pl.when(h == pl.num_programs(1) - 1)
    def _():
        energy = acc_ref[...]
        en = jnp.max(energy, axis=-1, keepdims=True) - energy
        mx = jnp.max(en, axis=-1, keepdims=True)
        e = jnp.exp(en - mx)
        attn = e / jnp.sum(e, axis=-1, keepdims=True)  # softmax over C
        # fold acf.conv2 weight:  m = attn @ W2   (Ncls, Cout)
        m = jnp.dot(attn, w2_ref[...].astype(jnp.float32),
                    preferred_element_type=jnp.float32)
        m_ref[0] = m.astype(m_ref.dtype)


# ----------------------------------------------------------------------------
# Convolution = im2col (glue, bf16) + fused Pallas matmul
# ----------------------------------------------------------------------------
def conv2d(x, p, *, ksize=1, stride=1, padding=0, dilation=1, act="none",
           residual=None, gamma=None):
    """x: NHWC bf16.  p: {'W':(Kp,Np) bf16, 'scale','shift':(1,Np) f32, 'cout':int}."""
    B, H, W, C = x.shape
    if ksize == 1:
        xs = x[:, ::stride, ::stride, :] if stride > 1 else x
        _, Ho, Wo, _ = xs.shape
        cols = xs.reshape(B * Ho * Wo, C)
    else:
        Ho = (H + 2 * padding - dilation * (ksize - 1) - 1) // stride + 1
        Wo = (W + 2 * padding - dilation * (ksize - 1) - 1) // stride + 1
        xp = jnp.pad(x, ((0, 0), (padding, padding), (padding, padding), (0, 0)))
        taps = []
        for ky in range(ksize):
            for kx in range(ksize):
                ys, xs_ = ky * dilation, kx * dilation
                taps.append(
                    xp[:, ys : ys + stride * (Ho - 1) + 1 : stride,
                       xs_ : xs_ + stride * (Wo - 1) + 1 : stride, :]
                )
        # TODO(synk): im2col is materialized (bf16, M-tiled); true tap-folded
        # K-reduction reading the padded map in-place needs unaligned windowed
        # BlockSpecs / manual DMA and is left out for robustness.
        cols = jnp.concatenate(taps, axis=-1).reshape(B * Ho * Wo, ksize * ksize * C)
    res2 = residual.reshape(B * Ho * Wo, -1) if residual is not None else None
    y = fused_matmul(cols, p["W"], p["scale"], p["shift"], p["cout"], act=act,
                     residual=res2, gamma=gamma)
    return y.reshape(B, Ho, Wo, p["cout"])


# ----------------------------------------------------------------------------
# Deterministic parameter construction (synthetic, mirrors module shapes).
# Weights are pre-padded to (Kp, Np) multiples of 128 and cast to bf16 at build
# time; folded-BN scale/shift stay f32.
# ----------------------------------------------------------------------------
def make_conv(key, cin, cout, k, *, bias=False, bn=False):
    ks = jax.random.split(key, 6)
    K = k * k * cin
    W = jax.random.normal(ks[0], (K, cout), jnp.float32) / np.sqrt(K)
    b = (0.01 * jax.random.normal(ks[1], (cout,), jnp.float32)) if bias \
        else jnp.zeros((cout,), jnp.float32)
    if bn:  # fold inference-mode BN into per-channel scale/shift
        g = 1.0 + 0.1 * jax.random.normal(ks[2], (cout,), jnp.float32)
        beta = 0.1 * jax.random.normal(ks[3], (cout,), jnp.float32)
        mean = 0.05 * jax.random.normal(ks[4], (cout,), jnp.float32)
        var = 1.0 + 0.1 * jnp.abs(jax.random.normal(ks[5], (cout,), jnp.float32))
        inv = g / jnp.sqrt(var + EPS)
        scale = inv
        shift = beta + inv * (b - mean)
    else:
        scale = jnp.ones((cout,), jnp.float32)
        shift = b
    Kp, Np = _round_up(K, 128), _round_up(cout, 128)
    return {
        "W": jnp.pad(W, ((0, Kp - K), (0, Np - cout))).astype(jnp.bfloat16),
        "scale": jnp.pad(scale.reshape(1, cout), ((0, 0), (0, Np - cout))),
        "shift": jnp.pad(shift.reshape(1, cout), ((0, 0), (0, Np - cout))),
        "cout": cout,
    }


def make_bottleneck(key, inplanes, planes, stride, dilation, multi_grid, downsample):
    ks = jax.random.split(key, 4)
    blk = {
        "conv1": make_conv(ks[0], inplanes, planes, 1, bn=True),
        "conv2": make_conv(ks[1], planes, planes, 3, bn=True),
        "conv3": make_conv(ks[2], planes, planes * 4, 1, bn=True),
        "stride": stride,
        "dil": dilation * multi_grid,
    }
    if downsample:
        blk["down"] = make_conv(ks[3], inplanes, planes * 4, 1, bn=True)
    return blk


def make_layer(key, inplanes, planes, blocks, stride=1, dilation=1, multi_grid=1):
    def gen_mg(i, grids):
        return grids[i % len(grids)] if isinstance(grids, tuple) else 1

    keys = jax.random.split(key, blocks)
    layer = []
    need_ds = stride != 1 or inplanes != planes * 4
    layer.append(make_bottleneck(keys[0], inplanes, planes, stride, dilation,
                                 gen_mg(0, multi_grid), need_ds))
    inplanes = planes * 4
    for i in range(1, blocks):
        layer.append(make_bottleneck(keys[i], inplanes, planes, 1, dilation,
                                     gen_mg(i, multi_grid), False))
    return layer, inplanes


def build_resnet_params(key, num_classes, layers=(1, 1, 1, 1)):
    ks = jax.random.split(key, 16)
    p = {}
    p["conv1"] = make_conv(ks[0], 3, 64, 3, bn=True)
    p["conv2"] = make_conv(ks[1], 64, 64, 3, bn=True)
    p["conv3"] = make_conv(ks[2], 64, 128, 3, bn=True)
    inplanes = 128
    p["layer1"], inplanes = make_layer(ks[3], inplanes, 64, layers[0])
    p["layer2"], inplanes = make_layer(ks[4], inplanes, 128, layers[1], stride=2)
    p["layer3"], inplanes = make_layer(ks[5], inplanes, 256, layers[2], stride=1, dilation=2)
    p["layer4"], inplanes = make_layer(ks[6], inplanes, 512, layers[3], stride=1,
                                       dilation=4, multi_grid=(1, 1, 1))
    # dsn: Conv2d(2048,512,3,p=1,bias) + InPlaceABNSync(leaky) + Dropout + Conv2d(512,nc,1,bias)
    p["dsn_conv"] = make_conv(ks[7], 2048, 512, 3, bias=True, bn=True)
    p["dsn_cls"] = make_conv(ks[8], 512, num_classes, 1, bias=True)
    # head: ACFModule(2048, 512, num_classes)
    p["head_conva"] = make_conv(ks[9], 2048, 512, 1)                 # bias=False
    p["acf_conv1"] = make_conv(ks[10], 2048, 512, 1, bias=True)
    p["acf_conv2"] = make_conv(ks[11], 512, 512, 1, bias=True)
    p["head_bot_conv"] = make_conv(ks[12], 512, 512, 3, bn=True)     # + leaky ABN
    p["head_bot_cls"] = make_conv(ks[13], 512, num_classes, 1, bias=True)
    p["gamma"] = jnp.zeros((1, 1), jnp.float32)
    return p


# ----------------------------------------------------------------------------
# Forward pass
# ----------------------------------------------------------------------------
def bottleneck_forward(x, blk):
    h = conv2d(x, blk["conv1"], ksize=1, act="relu")
    h = conv2d(h, blk["conv2"], ksize=3, stride=blk["stride"],
               padding=blk["dil"], dilation=blk["dil"], act="relu")
    if "down" in blk:
        res = conv2d(x, blk["down"], ksize=1, stride=blk["stride"], act="none")
    else:
        res = x
    # residual add + ReLU fused into the conv3 matmul epilogue
    return conv2d(h, blk["conv3"], ksize=1, act="relu", residual=res)


def acf_head_forward(params, x, coarse_x):
    """ACFModule: attention + conva + gamma-combine + bottleneck conv + classifier."""
    B, H, W, _ = x.shape
    nc = coarse_x.shape[-1]
    HW = H * W
    feat_ffm = conv2d(x, params["acf_conv1"], ksize=1, act="none")    # (B,H,W,512)
    C = feat_ffm.shape[-1]

    ncp = _round_up(nc, 16)
    HWp0 = _round_up(HW, 128)
    thw = min(512, HWp0)
    HWp = _round_up(HW, thw)

    q_flat = coarse_x.reshape(B, HW, nc).astype(jnp.bfloat16)         # (B, HW, nc)
    qt = jnp.transpose(q_flat, (0, 2, 1))                             # proj_query (B,nc,HW)
    qt = jnp.pad(qt, ((0, 0), (0, ncp - nc), (0, HWp - HW)))
    kf = jnp.pad(feat_ffm.reshape(B, HW, C).astype(jnp.bfloat16),
                 ((0, 0), (0, HWp - HW), (0, 0)))                     # proj_key (B,HW,C)
    w2 = params["acf_conv2"]["W"]                                     # (512,512) bf16

    # m[b] = softmax(max(E)-E) @ W2 with E = proj_query @ proj_key (HW-tiled reduction)
    m = pl.pallas_call(
        _acf_energy_kernel,
        out_shape=jax.ShapeDtypeStruct((B, ncp, C), jnp.float32),
        grid_spec=pltpu.PrefetchScalarGridSpec(
            num_scalar_prefetch=0,
            grid=(B, HWp // thw),
            in_specs=[
                pl.BlockSpec((1, ncp, thw), lambda b, h: (b, 0, h)),
                pl.BlockSpec((1, thw, C), lambda b, h: (b, h, 0)),
                pl.BlockSpec((C, C), lambda b, h: (0, 0)),
            ],
            out_specs=pl.BlockSpec((1, ncp, C), lambda b, h: (b, 0, 0)),
            scratch_shapes=[pltpu.VMEM((ncp, C), jnp.float32)],
        ),
        compiler_params=pltpu.CompilerParams(
            dimension_semantics=("parallel", "arbitrary"),
            vmem_limit_bytes=VMEM_LIMIT,
        ),
    )(qt, kf, w2)

    # class_output[b] = proj_value[b]^T @ (attn[b] @ W2) + b2  ==  q_flat[b] @ m[b] + b2
    Kq = _round_up(ncp, 128)
    mp = jnp.pad(m.astype(jnp.bfloat16), ((0, 0), (0, Kq - ncp), (0, 0)))
    class_rows = []
    for b in range(B):
        class_rows.append(
            fused_matmul(q_flat[b], mp[b], params["acf_conv2"]["scale"],
                         params["acf_conv2"]["shift"], C, act="none"))
    class_output = jnp.stack(class_rows, 0).reshape(B, H, W, C)

    # feat_sum = gamma * class_output + conva(x)   (fused into conva epilogue)
    feat_sum = conv2d(x, params["head_conva"], ksize=1, act="none",
                      residual=class_output, gamma=params["gamma"])
    h = conv2d(feat_sum, params["head_bot_conv"], ksize=3, padding=1, act="leaky")
    # TODO(synk): Dropout2d(0.1) is identity in inference mode (no train-time drop).
    return conv2d(h, params["head_bot_cls"], ksize=1, act="none")


def resnet_forward(params, x_nchw):
    x = jnp.transpose(x_nchw, (0, 2, 3, 1)).astype(jnp.bfloat16)  # NCHW -> NHWC bf16
    x = conv2d(x, params["conv1"], ksize=3, stride=2, padding=1, act="relu")
    x = conv2d(x, params["conv2"], ksize=3, padding=1, act="relu")
    x = conv2d(x, params["conv3"], ksize=3, padding=1, act="relu")
    x = maxpool_3x3_s2_p1_ceil(x)
    for name in ("layer1", "layer2", "layer3", "layer4"):
        for blk in params[name]:
            x = bottleneck_forward(x, blk)
    # dsn branch
    h = conv2d(x, params["dsn_conv"], ksize=3, padding=1, act="leaky")
    # TODO(synk): Dropout2d(0.1) is identity in inference mode (no train-time drop).
    x_dsn = conv2d(h, params["dsn_cls"], ksize=1, act="none")
    # head (ACF) branch
    x_head = acf_head_forward(params, x, x_dsn)
    # back to NCHW / f32 to match PyTorch output convention
    return [jnp.transpose(x_head, (0, 3, 1, 2)).astype(jnp.float32),
            jnp.transpose(x_dsn, (0, 3, 1, 2)).astype(jnp.float32)]
    # TODO(synk): criterion/labels training path not implemented (inference only).


if __name__ == "__main__":
    key = jax.random.PRNGKey(0)
    pkey, xkey = jax.random.split(key)
    num_classes = 16
    params = build_resnet_params(pkey, num_classes, layers=(1, 1, 1, 1))
    x = jax.random.normal(xkey, (2, 3, 32, 32), jnp.float32)
    outs = resnet_forward(params, x)
    outs = [jax.block_until_ready(o) for o in outs]
    assert outs[0].shape == (2, num_classes, 5, 5), outs[0].shape
    assert outs[1].shape == (2, num_classes, 5, 5), outs[1].shape
    assert all(bool(jnp.all(jnp.isfinite(o))) for o in outs)
    print("KERNEL_OK")
</pallas_src>

<mosaic_0001>
module attributes {stable_mosaic.version = 11 : i64} {
  func.func @_matmul_kernel(%arg0: i32, %arg1: i32, %arg2: i32, %arg3: memref<256x128xbf16, #tpu.memory_space<vmem>>, %arg4: memref<128x128xbf16, #tpu.memory_space<vmem>>, %arg5: memref<1x128xf32, #tpu.memory_space<vmem>>, %arg6: memref<1x128xf32, #tpu.memory_space<vmem>>, %arg7: memref<256x128xbf16, #tpu.memory_space<vmem>>, %arg8: memref<256x128xf32, #tpu.memory_space<vmem>>) attributes {dimension_semantics = [#tpu.dimension_semantics<parallel>, #tpu.dimension_semantics<parallel>, #tpu.dimension_semantics<arbitrary>], iteration_bounds = array<i64: 2, 1, 1>, scalar_prefetch = 0 : i64, scratch_operands = 1 : i64, tpu.core_type = #tpu.core_type<tc>, window_params = [{transform_indices = @transform_0, window_bounds = array<i64: 256, 128>}, {transform_indices = @transform_1, window_bounds = array<i64: 128, 128>}, {transform_indices = @transform_2, window_bounds = array<i64: 1, 128>}, {transform_indices = @transform_3, window_bounds = array<i64: 1, 128>}, {transform_indices = @transform_4, window_bounds = array<i64: 256, 128>}]} {
    %c0_i32 = arith.constant 0 : i32
    %0 = arith.cmpi eq, %arg2, %c0_i32 : i32
    %1 = arith.extui %0 : i1 to i32
    %c0_i32_0 = arith.constant 0 : i32
    %2 = arith.cmpi ne, %1, %c0_i32_0 : i32
    scf.if %2 {
      %cst_10 = arith.constant 0.000000e+00 : f32
      %12 = vector.broadcast %cst_10 : f32 to vector<256x128xf32>
      %c0_11 = arith.constant 0 : index
      %c0_12 = arith.constant 0 : index
      %13 = vector.load %arg8[%c0_11, %c0_12] : memref<256x128xf32, #tpu.memory_space<vmem>>, vector<256x128xf32>
      tpu.vector_store %arg8[%c0_11, %c0_12], %12 {strides = array<i32>} : memref<256x128xf32, #tpu.memory_space<vmem>>, vector<256x128xf32>,
    } else {
    }
    %c0 = arith.constant 0 : index
    %c0_1 = arith.constant 0 : index
    %3 = vector.load %arg8[%c0, %c0_1] : memref<256x128xf32, #tpu.memory_space<vmem>>, vector<256x128xf32>
    %c0_2 = arith.constant 0 : index
    %c0_3 = arith.constant 0 : index
    %4 = vector.load %arg3[%c0_2, %c0_3] : memref<256x128xbf16, #tpu.memory_space<vmem>>, vector<256x128xbf16>
    %c0_4 = arith.constant 0 : index
    %c0_5 = arith.constant 0 : index
    %5 = vector.load %arg4[%c0_4, %c0_5] : memref<128x128xbf16, #tpu.memory_space<vmem>>, vector<128x128xbf16>
    %cst = arith.constant dense<0.000000e+00> : vector<256x128xf32>
    %6 = tpu.matmul %4, %5, %cst {dimension_numbers = #tpu.dot_dimension_numbers<[1], [0], [0], [1], [0, 0, 1, 1], [], []>} : vector<256x128xbf16>, vector<128x128xbf16>, vector<256x128xf32> -> vector<256x128xf32>
    %7 = arith.addf %3, %6 : vector<256x128xf32>
    %c0_6 = arith.constant 0 : index
    %c0_7 = arith.constant 0 : index
    %8 = vector.load %arg8[%c0_6, %c0_7] : memref<256x128xf32, #tpu.memory_space<vmem>>, vector<256x128xf32>
    tpu.vector_store %arg8[%c0_6, %c0_7], %7 {strides = array<i32>} : memref<256x128xf32, #tpu.memory_space<vmem>>, vector<256x128xf32>,
    %c0_i32_8 = arith.constant 0 : i32
    %9 = arith.cmpi eq, %arg2, %c0_i32_8 : i32
    %10 = arith.extui %9 : i1 to i32
    %c0_i32_9 = arith.constant 0 : i32
    %11 = arith.cmpi ne, %10, %c0_i32_9 : i32
    scf.if %11 {
      %c0_10 = arith.constant 0 : index
      %c0_11 = arith.constant 0 : index
      %12 = vector.load %arg8[%c0_10, %c0_11] : memref<256x128xf32, #tpu.memory_space<vmem>>, vector<256x128xf32>
      %c0_12 = arith.constant 0 : index
      %c0_13 = arith.constant 0 : index
      %13 = vector.load %arg5[%c0_12, %c0_13] : memref<1x128xf32, #tpu.memory_space<vmem>>, vector<1x128xf32>
      %14 = vector.broadcast %13 : vector<1x128xf32> to vector<256x128xf32>
      %15 = arith.mulf %12, %14 : vector<256x128xf32>
      %c0_14 = arith.constant 0 : index
      %c0_15 = arith.constant 0 : index
      %16 = vector.load %arg6[%c0_14, %c0_15] : memref<1x128xf32, #tpu.memory_space<vmem>>, vector<1x128xf32>
      %17 = vector.broadcast %16 : vector<1x128xf32> to vector<256x128xf32>
      %18 = arith.addf %15, %17 : vector<256x128xf32>
      %cst_16 = arith.constant 0.000000e+00 : f32
      %19 = vector.broadcast %cst_16 : f32 to vector<256x128xf32>
      %20 = arith.maximumf %18, %19 : vector<256x128xf32>
      %21 = arith.truncf %20 : vector<256x128xf32> to vector<256x128xbf16>
      %c0_17 = arith.constant 0 : index
      %c0_18 = arith.constant 0 : index
      %22 = vector.load %arg7[%c0_17, %c0_18] : memref<256x128xbf16, #tpu.memory_space<vmem>>, vector<256x128xbf16>
      tpu.vector_store %arg7[%c0_17, %c0_18], %21 {strides = array<i32>} : memref<256x128xbf16, #tpu.memory_space<vmem>>, vector<256x128xbf16>,
    } else {
    }
    return
  }
  func.func @transform_0(%arg0: i32, %arg1: i32, %arg2: i32) -> (i32, i32) {
    %c0_i32 = arith.constant 0 : i32
    return %arg0, %arg2 : i32, i32
  }
  func.func @transform_1(%arg0: i32, %arg1: i32, %arg2: i32) -> (i32, i32) {
    %c0_i32 = arith.constant 0 : i32
    return %arg2, %arg1 : i32, i32
  }
  func.func @transform_2(%arg0: i32, %arg1: i32, %arg2: i32) -> (i32, i32) {
    %c0_i32 = arith.constant 0 : i32
    %c0_i32_0 = arith.constant 0 : i32
    return %c0_i32, %arg1 : i32, i32
  }
  func.func @transform_3(%arg0: i32, %arg1: i32, %arg2: i32) -> (i32, i32) {
    %c0_i32 = arith.constant 0 : i32
    %c0_i32_0 = arith.constant 0 : i32
    return %c0_i32, %arg1 : i32, i32
  }
  func.func @transform_4(%arg0: i32, %arg1: i32, %arg2: i32) -> (i32, i32) {
    %c0_i32 = arith.constant 0 : i32
    return %arg0, %arg1 : i32, i32
  }
}

</mosaic_0001>

<bundles_post_ra>
// kernel: tpu_custom_call.1
= control target key start
LH: loop header
LB: loop body
LE: loop exit
PB: predicated region body
PF: predicated region fallthrough
CT: control target
= control target key end

     0   :  { %9 = vsyncpa [#allocation4], 0  ;;  %s2292_s0 = inlined_call_operand.hbm [shape: bf16[512,128], index: 0, kind: input, shape index: {}]   ;;  %s2293_s1 = inlined_call_operand.hbm [shape: bf16[128,128], index: 1, kind: input, shape index: {}]   ;;  %s2294_s2 = inlined_call_operand.hbm [shape: f32[1,128], index: 2, kind: input, shape index: {}]   ;;  %s2295_s3 = inlined_call_operand.hbm [shape: f32[1,128], index: 3, kind: input, shape index: {}]   ;;  %s2296_s4 = inlined_call_operand.hbm [shape: bf16[512,128], index: 4, kind: output, shape index: {}]  }
   0x1   :  { %11 = vsyncpa [#allocation4 + $0x1], 0 }
   0x2   :  { %12 = vsyncpa [#allocation7], 0 }
   0x3   :  { %13 = vsyncpa [#allocation10], 0 }
   0x4   :  { %14 = vsyncpa [#allocation5], 0 }
   0x5   :  { %16 = vsyncpa [#allocation5 + $0x1], 0  ;;  %s1896_s15 = smov 0   ;;  %s1898_s16 = smov 0  }
   0x6   :  { %s1900_s17 = smov 0   ;;  %s1902_s18 = smov 0  }
   0x7   :  { %s1904_s19 = smov 0   ;;  %s1906_s20 = smov 0  }
   0x8 LB: > { %s1239_s21 = sadd.s32 4294967295, %s1860_s20   ;;  %s1240_s22 = sadd.s32 4294967294, %s1860_s20   ;;  %s1860_s20 = sphi %s1906_s20, %s22_s20   ;;  %s1856_s19 = sphi %s1904_s19, %s2323_s19   ;;  %s1852_s18 = sphi %s1902_s18, %s2322_s18   ;;  %s1848_s17 = sphi %s1900_s17, %s2321_s17   ;;  %s1844_s16 = sphi %s1898_s16, %s2320_s16   ;;  %s1840_s15 = sphi %s1896_s15, %s2319_s15  }
   0x9   : > { %p63_p0 = scmp.ne.s32.totalorder %s1844_s16, %s1840_s15  ;;  %p1930_p1 = scmp.eq.s32.totalorder %s1239_s21, 0 }
   0xa   : > { %p1934_p2 = scmp.eq.s32.totalorder %s1239_s21, 1  ;;  %p175_p3 = scmp.eq.s32.totalorder %s1240_s22, 1 }
   0xb   : > { %s2302_s23 = scalar_select %p1930_p1, 1, 0 }
   0xc   : > { %s2303_s24 = scalar_select %p1934_p2, 1, 0 }
   0xd   : > { %p1940_p4 = por %p1930_p1, %p63_p0  ;;  %p1241_p5 = scmp.ge.s32.totalorder %s1860_s20, 1 }
   0xe   : > { %p1945_p6 = por %p175_p3, %p63_p0  ;;  %p182_p7 = scmp.lt.s32.totalorder %s1860_s20, 3 }
   0xf   : > { %s2304_s25 = scalar_select %p1940_p4, 1, 0 }
  0x10   : > { %s2305_s26 = scalar_select %p1945_p6, 1, 0 }
  0x11   : > { %p1950_p8 = pnand %p1241_p5, %p182_p7  ;;  %s1862_s28 = smov [#allocation6]  }
  0x12   : > { %2306 = sst [smem:[#allocation16_spill]] %s2305_s26  ;;  %s198_s29 = sshll.u32 %s1862_s28, 4  ;;  %s1954_s29 = int_to_ptr.vmem [resolvable:$true] %s198_s29 }
  0x13   : > { %s2307_s27 = scalar_select %p1950_p8, 1, 0 }
  0x14   : > { %p1551_p9 = pneg %p1950_p8  ;;  %s1863_s5 = smov [#allocation8]  }
  0x15   : > { %s214_s6 = sshll.u32 %s1863_s5, 4  ;;  %s1864_s7 = smov [#allocation9]   ;;  %s1965_s6 = int_to_ptr.vmem [resolvable:$true] %s214_s6 }
  0x16   : > { %p1961_p11 = pnand %p1551_p9, %p1930_p1  ;;  %s1967_s8 = sshll.u32 %s1864_s7, 4  ;;  %s228_s8 = int_to_ptr.vmem [resolvable:$true] %s1967_s8 }
  0x17   : > { %s1656_s11 = scalar_lea.hbm %s2293_s1, 1024 }
  0x18   : > { %p1657_p12 = scmp.ne.s32.totalorder %s2293_s1, %s1656_s11  ;;  %p1977_p13 = pneg %p1961_p11 }
  0x19   : > { %p1663_p5 = scmp.lt.u32.totalorder %s1656_s11, %s2293_s1 }
  0x1a   : > { %p1659_p0 = pnand %p1977_p13, %p1657_p12 }
  0x1c   : > { %p1660_p3 = pneg %p1659_p0 }
  0x1e   : > { %p1665_p7 = pnand %p1663_p5, %p1660_p3 }
  0x20   : > { %1668 = shalt.err (!%p1665_p7)
}
  0x21   : > { %s1669_s28 = scalar_lea.vmem %s1954_s29, 1024  ;;  %p1677_p1 = scmp.lt.s32.totalorder %s1954_s29, %s1954_s29 }
  0x22   : > { %p1670_p9 = scmp.ne.s32.totalorder %s1954_s29, %s1669_s28  ;;  %p1678_p4 = scmp.lt.s32.totalorder %s1669_s28, %s1669_s28 }
  0x24   : > { %p1672_p10 = pnand %p1670_p9, %p1977_p13  ;;  %p1679_p12 = por %p1678_p4, %p1677_p1 }
  0x26   : > { %p1673_p6 = pneg %p1672_p10 }
  0x28   : > { %p1680_p0 = pnand %p1679_p12, %p1673_p6 }
  0x2a   : > { %1683 = shalt.err (!%p1680_p0)
}
  0x2b   : > { %s1865_s5 = smov 64   ;;  %s1866_s7 = smov 4  }
  0x2c   : > { %1554 = dma.hbm_to_vmem [thread:$0]  (!%p1961_p11), %s2293_s1, 1024, %s1954_s29, [#allocation7], %s1865_s5, %s1865_s5, %s1866_s7  }
  0x2d   : > { %s1684_s13 = scalar_lea.hbm %s2294_s2, 16 }
  0x2e   : > { %p1685_p1 = scmp.ne.s32.totalorder %s2294_s2, %s1684_s13  ;;  %p1691_p10 = scmp.lt.u32.totalorder %s1684_s13, %s2294_s2 }
  0x30   : > { %p1687_p4 = pnand %p1685_p1, %p1977_p13 }
  0x32   : > { %p1688_p6 = pneg %p1687_p4 }
  0x34   : > { %p1693_p3 = pnand %p1691_p10, %p1688_p6 }
  0x36   : > { %1696 = shalt.err (!%p1693_p3)
}
  0x37   : > { %s1697_s29 = scalar_lea.vmem %s1965_s6, 16  ;;  %s1704_s9 = scalar_lea.vmem %s1965_s6, 32 }
  0x38   : > { %p1698_p5 = scmp.ne.s32.totalorder %s1965_s6, %s1697_s29  ;;  %p1705_p12 = scmp.lt.s32.totalorder %s1965_s6, %s1965_s6 }
  0x39   : > { %p1706_p0 = scmp.lt.s32.totalorder %s1704_s9, %s1697_s29 }
  0x3a   : > { %p1700_p7 = pnand %p1698_p5, %p1977_p13 }
  0x3b   : > { %p1707_p1 = por %p1706_p0, %p1705_p12 }
  0x3c   : > { %p1701_p9 = pneg %p1700_p7 }
  0x3e   : > { %p1708_p4 = pnand %p1707_p1, %p1701_p9 }
  0x40   : > { %1711 = shalt.err (!%p1708_p4)
}
  0x41   : > { %1557 = dma.hbm_to_vmem [thread:$0]  (!%p1961_p11), %s2294_s2, 16, %s1965_s6, [#allocation7]  }
  0x42   : > { %s1712_s13 = scalar_lea.hbm %s2295_s3, 16 }
  0x43   : > { %p1713_p6 = scmp.ne.s32.totalorder %s2295_s3, %s1712_s13  ;;  %p1719_p5 = scmp.lt.u32.totalorder %s1712_s13, %s2295_s3 }
  0x45   : > { %p1715_p10 = pnand %p1713_p6, %p1977_p13 }
  0x47   : > { %p1716_p3 = pneg %p1715_p10 }
  0x49   : > { %p1721_p7 = pnand %p1719_p5, %p1716_p3 }
  0x4b   : > { %1724 = shalt.err (!%p1721_p7)
}
  0x4c   : > { %s1725_s9 = scalar_lea.vmem %s228_s8, 16  ;;  %s1732_s6 = scalar_lea.vmem %s228_s8, 32 }
  0x4d   : > { %p1726_p9 = scmp.ne.s32.totalorder %s228_s8, %s1725_s9  ;;  %p1733_p1 = scmp.lt.s32.totalorder %s228_s8, %s228_s8 }
  0x4e   : > { %p1734_p4 = scmp.lt.s32.totalorder %s1732_s6, %s1725_s9 }
  0x4f   : > { %p1728_p12 = pnand %p1726_p9, %p1977_p13 }
  0x50   : > { %p1735_p8 = por %p1734_p4, %p1733_p1 }
  0x51   : > { %p1729_p0 = pneg %p1728_p12 }
  0x53   : > { %p1736_p2 = pnand %p1735_p8, %p1729_p0 }
  0x55   : > { %1739 = shalt.err (!%p1736_p2)
}
  0x56   : > { %1560 = dma.hbm_to_vmem [thread:$0]  (!%p1961_p11), %s2295_s3, 16, %s228_s8, [#allocation10]  }
  0x57   : > { %s50_s14 = sadd.s32 1, %s1848_s17  ;;  %s41_s11 = sadd.s32 1, %s1856_s19 }
  0x58   : > { %p57_p2 = scmp.ne.s32.totalorder %s1848_s17, %s1844_s16  ;;  %p43_p8 = scmp.ge.s32.totalorder %s41_s11, 2 }
  0x59   : > { %p58_p13 = scmp.eq.s32.totalorder %s1860_s20, 0  ;;  %p2310_p6 = scmp.ne.s32.totalorder %s2303_s24, 0 }
  0x5a   : > { %p1572_p3 = scmp.lt.s32.totalorder %s1860_s20, 2  ;;  %s2325_s11 = smov (%p43_p8, %s41_s11), 0 }
  0x5b   : > { %p2051_p10 = por %p2310_p6, %p57_p2  ;;  %p59_p5 = por %p58_p13, %p57_p2 }
  0x5c   : > { %s238_s12 = sand.u32 1, %s1848_s17   ;;  %s45_s13 = ssub.s32 %s1856_s19, %s2325_s11 }
  0x5d   : > { %p48_p7 = scmp.eq.s32.totalorder %s45_s13, 0  ;;  %s1246_s8 = sshll.u32 %s238_s12, 7 }
  0x5e   : > { %s1318_s21 = sshll.u32 %s1856_s19, 11  ;;  %s242_s9 = scalar_lea.vmem [#allocation3], %s1246_s8 }
  0x5f   : > { %s2063_s22 = scalar_select %p48_p7, %s1848_s17, %s50_s14  }
  0x60   : > { %s2068_s24 = scalar_lea.hbm %s2292_s0, %s1318_s21  ;;  %s250_s6 = sshll.u32 %s242_s9, 4  ;;  %s2070_s6 = int_to_ptr.vmem [resolvable:$true] %s250_s6 }
  0x61   : > { %p2074_p11 = pnand %p1572_p3, %p59_p5  ;;  %s2078_s10 = scalar_lea.sflag [#allocation4], %s238_s12 }
  0x62   : > { %s1740_s14 = scalar_lea.hbm %s2068_s24, 2048  ;;  %s1745_s21 = scalar_lea.hbm %s2292_s0, 4096 }
  0x63   : > { %p1741_p9 = scmp.ne.s32.totalorder %s2068_s24, %s1740_s14  ;;  %p1742_p12 = pneg %p2074_p11 }
  0x64   : > { %p1746_p4 = scmp.lt.u32.totalorder %s2068_s24, %s2292_s0  ;;  %p1747_p2 = scmp.lt.u32.totalorder %s1745_s21, %s1740_s14 }
  0x65   : > { %p1743_p0 = pnand %p1742_p12, %p1741_p9  ;;  %p1749_p13 = scmp.lt.u32.totalorder %s1740_s14, %s2068_s24 }
  0x66   : > { %p1748_p8 = por %p1747_p2, %p1746_p4 }
  0x67   : > { %p1744_p1 = pneg %p1743_p0 }
  0x68   : > { %p1750_p6 = por %p1749_p13, %p1748_p8 }
  0x6a   : > { %p1751_p3 = pnand %p1750_p6, %p1744_p1 }
  0x6c   : > { %1754 = shalt.err (!%p1751_p3)
}
  0x6d   : > { %s1755_s12 = scalar_lea.vmem %s2070_s6, 2048  ;;  %s1867_s9 = smov [#allocation3]  }
  0x6e   : > { %p1756_p5 = scmp.ne.s32.totalorder %s2070_s6, %s1755_s12  ;;  %s1760_s13 = sshll.u32 %s1867_s9, 4  ;;  %s1761_s13 = int_to_ptr.vmem [resolvable:$false] %s1760_s13 }
  0x6f   : > { %s1762_s8 = scalar_lea.vmem %s1761_s13, 4096  ;;  %p1763_p0 = scmp.lt.s32.totalorder %s2070_s6, %s1761_s13 }
  0x70   : > { %p1758_p7 = pnand %p1756_p5, %p1742_p12  ;;  %p1764_p4 = scmp.lt.s32.totalorder %s1762_s8, %s1755_s12 }
  0x72   : > { %p1759_p9 = pneg %p1758_p7  ;;  %p1765_p2 = por %p1764_p4, %p1763_p0 }
  0x74   : > { %p1766_p8 = pnand %p1765_p2, %p1759_p9 }
  0x76   : > { %1769 = shalt.err (!%p1766_p8)
}
  0x77   : > { %1564 = dma.hbm_to_vmem [thread:$0]  (!%p2074_p11), %s2068_s24, 2048, %s2070_s6, %s2078_s10, %s1865_s5, %s1865_s5, %s1866_s7  }
  0x78   : > { %p2313_p12 = scmp.ne.s32.totalorder %s2307_s27, 0 }
  0x79   : > { %s2112_s14 = sand.u32 (!%p2313_p12), 1, %s1844_s16   ;;  %p2314_p1 = scmp.ne.s32.totalorder (!%p2313_p12), %s2304_s25, 0 }
  0x7a   : > { %262 = sbr.rel (%p2313_p12) target bundleno = 431 (0x1af), region = 36  ;;  %s1250_s21 = sshll.u32 (!%p2313_p12), %s2112_s14, 7 }
  0x7b   : > { %s265_s28 = scalar_lea.sflag (!%p2313_p12), [#allocation4], %s2112_s14  ;;  %s2118_s26 = scalar_lea.vmem (!%p2313_p12), [#allocation3], %s1250_s21 }
  0x81   : > { %1823 = dma.done.wait (%p2314_p1), %s265_s28, 2048  }
  0x82   : > { %1825 = vsyncadd (%p2314_p1), %s265_s28, 4294965248  ;;  %p2315_p11 = scmp.ne.s32.totalorder %s2302_s23, 0 }
  0x84   : > { %1827 = dma.done.wait (%p2315_p11), [#allocation7], 1040  }
  0x85   : > { %1829 = vsyncadd (%p2315_p11), [#allocation7], 4294966256 }
  0x86   : > { %1831 = dma.done.wait (%p2315_p11), [#allocation10], 16  }
  0x87   : > { %1833 = vsyncadd (%p2315_p11), [#allocation10], 4294967280  ;;  %v1632_v0 = vld [vmem:[#allocation6] sm:$0xff]   ;;  %v1633_v1 = vld [vmem:[#allocation6 + $0x8] sm:$0xff]   ;;  %s2174_s23 = scalar_lea.vmem [#allocation11], %s1250_s21  ;;  %s1351_s25 = sshll.u32 %s1852_s18, 11 }
  0x88   : > { %1471 = vmatprep.subr.bf16.mxu0 %v1632_v0  ;;  %1519 = vmatprep.subr.bf16.mxu1 %v1632_v0  ;;  %v1634_v2 = vld [vmem:[#allocation6 + $0x10] sm:$0xff]   ;;  %v1635_v3 = vld [vmem:[#allocation6 + $0x18] sm:$0xff]   ;;  %v1640_v4 = vld [vmem:[%s2118_s26] sm:$0xff]   ;;  %s1114_s27 = sshll.u32 %s2174_s23, 4  ;;  %s2237_s18 = scalar_lea.hbm %s2296_s4, %s1351_s25  ;;  %s2239_s27 = int_to_ptr.vmem [resolvable:$true] %s1114_s27 }
  0x89   : > { %1472 = vmatpush3.bf16.msra.mxu0 %v1632_v0  ;;  %1527 = vmatpush3.bf16.msra.mxu1 %v1632_v0  ;;  %v1641_v5 = vld [vmem:[%s2118_s26 + $0x40] sm:$0xff]   ;;  %v1637_v7 = vld [vmem:[#allocation6 + $0x28] sm:$0xff]   ;;  %v1638_v8 = vld [vmem:[#allocation6 + $0x30] sm:$0xff]   ;;  %s1100_s24 = scalar_lea.sflag [#allocation5], %s2112_s14  ;;  %s1770_s6 = scalar_lea.vmem %s2239_s27, 2048 }
  0x8a   : > { %1473 = vmatprep.subr.bf16.mxu0 %v1633_v1  ;;  %1520 = vmatprep.subr.bf16.mxu1 %v1633_v1  ;;  %v1636_v6 = vld [vmem:[#allocation6 + $0x20] sm:$0xff]   ;;  %v1639_v9 = vld [vmem:[#allocation6 + $0x38] sm:$0xff]   ;;  %v1642_v10 = vld [vmem:[%s2118_s26 + $0x8] sm:$0xff]   ;;  %p1771_p13 = scmp.ne.s32.totalorder %s2239_s27, %s1770_s6  ;;  %s1868_s10 = smov [#allocation11]  }
  0x8b   : > { %1487 = vmatprep.mubr.bf16.mxu0 %v1640_v4  ;;  %1503 = vmatprep.mubr.bf16.mxu1 %v1641_v5  ;;  %v1643_v11 = vld [vmem:[%s2118_s26 + $0x48] sm:$0xff]   ;;  %v1644_v12 = vld [vmem:[%s2118_s26 + $0x10] sm:$0xff]   ;;  %v1646_v14 = vld [vmem:[%s2118_s26 + $0x18] sm:$0xff]   ;;  %s1774_s29 = sshll.u32 %s1868_s10, 4  ;;  %s1775_s29 = int_to_ptr.vmem [resolvable:$false] %s1774_s29 }
  0x8c   : > { %v1645_v13 = vld [vmem:[%s2118_s26 + $0x50] sm:$0xff]   ;;  %v1647_v15 = vld [vmem:[%s2118_s26 + $0x58] sm:$0xff]   ;;  %v1648_v16 = vld [vmem:[%s2118_s26 + $0x20] sm:$0xff]   ;;  %p1772_p6 = pnand %p1771_p13, %p2051_p10  ;;  %s1776_s12 = scalar_lea.vmem %s1775_s29, 4096 }
  0x8d   : > { %1474 = vmatpush3.bf16.msra.mxu0 %v1633_v1  ;;  %1528 = vmatpush3.bf16.msra.mxu1 %v1633_v1  ;;  %v1649_v17 = vld [vmem:[%s2118_s26 + $0x60] sm:$0xff]   ;;  %v1650_v18 = vld [vmem:[%s2118_s26 + $0x28] sm:$0xff]   ;;  %v1652_v20 = vld [vmem:[%s2118_s26 + $0x30] sm:$0xff]   ;;  %p1777_p5 = scmp.lt.s32.totalorder %s2239_s27, %s1775_s29  ;;  %p1778_p7 = scmp.lt.s32.totalorder %s1776_s12, %s1770_s6 }
  0x8e   : > { %1475 = vmatprep.subr.bf16.mxu0 %v1634_v2  ;;  %1521 = vmatprep.subr.bf16.mxu1 %v1634_v2  ;;  %v1651_v19 = vld [vmem:[%s2118_s26 + $0x68] sm:$0xff]   ;;  %v1653_v21 = vld [vmem:[%s2118_s26 + $0x70] sm:$0xff]   ;;  %v1654_v22 = vld [vmem:[%s2118_s26 + $0x38] sm:$0xff]   ;;  %p1773_p3 = pneg %p1772_p6 }
  0x8f   : > { %v1655_v23 = vld [vmem:[%s2118_s26 + $0x78] sm:$0xff]   ;;  %v2148_v24 = vld [vmem:[#allocation8] ss:$0 sm:$0xff]  ;;  %v2150_v26 = vld [vmem:[#allocation9] ss:$0 sm:$0xff]  ;;  %p1779_p9 = por %p1778_p7, %p1777_p5 }
  0x91   : > { %1476 = vmatpush3.bf16.msra.mxu0 %v1634_v2  ;;  %1529 = vmatpush3.bf16.msra.mxu1 %v1634_v2  ;;  %p1780_p0 = pnand %p1779_p9, %p1773_p3 }
  0x92   : > { %1477 = vmatprep.subr.bf16.mxu0 %v1635_v3  ;;  %1522 = vmatprep.subr.bf16.mxu1 %v1635_v3 }
  0x95   : > { %1478 = vmatpush3.bf16.msra.mxu0 %v1635_v3  ;;  %1530 = vmatpush3.bf16.msra.mxu1 %v1635_v3 }
  0x96   : > { %1479 = vmatprep.subr.bf16.mxu0 %v1636_v6  ;;  %1523 = vmatprep.subr.bf16.mxu1 %v1636_v6 }
  0x99   : > { %1480 = vmatpush3.bf16.msra.mxu0 %v1636_v6  ;;  %1531 = vmatpush3.bf16.msra.mxu1 %v1636_v6 }
  0x9a   : > { %1481 = vmatprep.subr.bf16.mxu0 %v1637_v7  ;;  %1524 = vmatprep.subr.bf16.mxu1 %v1637_v7 }
  0x9d   : > { %1482 = vmatpush3.bf16.msra.mxu0 %v1637_v7  ;;  %1532 = vmatpush3.bf16.msra.mxu1 %v1637_v7 }
  0x9e   : > { %1483 = vmatprep.subr.bf16.mxu0 %v1638_v8  ;;  %1525 = vmatprep.subr.bf16.mxu1 %v1638_v8 }
  0xa1   : > { %1484 = vmatpush3.bf16.msra.mxu0 %v1638_v8  ;;  %1533 = vmatpush3.bf16.msra.mxu1 %v1638_v8 }
  0xa2   : > { %1485 = vmatprep.subr.bf16.mxu0 %v1639_v9  ;;  %1526 = vmatprep.subr.bf16.mxu1 %v1639_v9 }
  0xa5   : > { %1486 = vmatpush3.bf16.msra.mxu0 %v1639_v9  ;;  %1534 = vmatpush3.bf16.msra.mxu1 %v1639_v9 }
  0xa8   : > { %1488 = vmatmul.mubr.bf16.vlgmr.msra.gmra.mrb[0].mxu0 %v1642_v10  ;;  %1504 = vmatmul.mubr.bf16.vlgmr.msra.gmra.mrb[0].mxu1 %v1643_v11 }
  0xa9   : > { %1491 = vmatprep.mubr.bf16.mxu0 %v1644_v12  ;;  %1507 = vmatprep.mubr.bf16.mxu1 %v1645_v13 }
  0xb0   : > { %1492 = vmatmul.mubr.bf16.gmra.mrb[4].mxu0 %v1646_v14  ;;  %1508 = vmatmul.mubr.bf16.gmra.mrb[4].mxu1 %v1647_v15 }
  0xb1   : > { %1495 = vmatprep.mubr.bf16.mxu0 %v1648_v16  ;;  %1511 = vmatprep.mubr.bf16.mxu1 %v1649_v17 }
  0xb8   : > { %1496 = vmatmul.mubr.bf16.gmra.mrb[8].mxu0 %v1650_v18  ;;  %1512 = vmatmul.mubr.bf16.gmra.mrb[8].mxu1 %v1651_v19 }
  0xb9   : > { %1499 = vmatprep.mubr.bf16.mxu0 %v1652_v20  ;;  %1515 = vmatprep.mubr.bf16.mxu1 %v1653_v21 }
  0xc0   : > { %1500 = vmatmul.mubr.bf16.gmra.mrb[12].mxu0 %v1654_v22  ;;  %1516 = vmatmul.mubr.bf16.gmra.mrb[12].mxu1 %v1655_v23 }
 0x17b   : > { %v1489_v25 = vpop.f32.mrb[0].mxu0  ;;  %v1505_v27 = vpop.f32.mrb[0].mxu1 }
 0x17c   : > { %v838_v28 = vmul.f32 %v1489_v25, %v2148_v24  ;;  %v854_v29 = vmul.f32 %v1505_v27, %v2148_v24  ;;  %v603_v30 = vpop.f32.mrb[1].mxu0  ;;  %v667_v31 = vpop.f32.mrb[1].mxu1 }
 0x17d   : > { %v836_v32 = vmul.f32 %v2148_v24, %v603_v30  ;;  %v852_v33 = vmul.f32 %v2148_v24, %v667_v31  ;;  %v1490_v34 = vpop.f32.mrb[2].mxu0  ;;  %v1506_v35 = vpop.f32.mrb[2].mxu1 }
 0x17e   : > { %v877_v36 = vadd.f32 %v2150_v26, %v838_v28  ;;  %v893_v37 = vadd.f32 %v2150_v26, %v854_v29  ;;  %v839_v38 = vmul.f32 %v1490_v34, %v2148_v24  ;;  %v855_v39 = vmul.f32 %v1506_v35, %v2148_v24  ;;  %v606_v40 = vpop.f32.mrb[3].mxu0  ;;  %v670_v41 = vpop.f32.mrb[3].mxu1 }
 0x17f   : > { %v875_v42 = vadd.f32 %v2150_v26, %v836_v32  ;;  %v891_v43 = vadd.f32 %v2150_v26, %v852_v33  ;;  %v837_v44 = vmul.f32 %v2148_v24, %v606_v40  ;;  %v853_v45 = vmul.f32 %v2148_v24, %v670_v41 }
 0x180   : > { %v878_v46 = vadd.f32 %v2150_v26, %v839_v38  ;;  %v894_v47 = vadd.f32 %v2150_v26, %v855_v39  ;;  %v909_v50 = vmax.f32 %v877_v36, 0.0  ;;  %v925_v51 = vmax.f32 %v893_v37, 0.0 }
 0x181   : > { %v876_v48 = vadd.f32 %v2150_v26, %v837_v44  ;;  %v892_v49 = vadd.f32 %v2150_v26, %v853_v45  ;;  %v907_v54 = vmax.f32 %v875_v42, 0.0  ;;  %v923_v55 = vmax.f32 %v891_v43, 0.0 }
 0x182   : > { %v910_v52 = vmax.f32 %v878_v46, 0.0  ;;  %v926_v53 = vmax.f32 %v894_v47, 0.0 }
 0x183   : > { %v908_v56 = vmax.f32 %v876_v48, 0.0  ;;  %v924_v57 = vmax.f32 %v892_v49, 0.0  ;;  %v1493_v58 = vpop.f32.mrb[4].mxu0  ;;  %v1509_v59 = vpop.f32.mrb[4].mxu1 }
 0x184   : > { %v1360_v60 = vpack.c.bf16 %v910_v52, %v909_v50  ;;  %v1400_v61 = vpack.c.bf16 %v926_v53, %v925_v51  ;;  %v842_v62 = vmul.f32 %v1493_v58, %v2148_v24  ;;  %v858_v63 = vmul.f32 %v1509_v59, %v2148_v24  ;;  %v619_v0 = vpop.f32.mrb[5].mxu0  ;;  %v683_v1 = vpop.f32.mrb[5].mxu1 }
 0x185   : > { %v1355_v2 = vpack.c.bf16 %v908_v56, %v907_v54  ;;  %v1395_v3 = vpack.c.bf16 %v924_v57, %v923_v55  ;;  %v840_v4 = vmul.f32 %v2148_v24, %v619_v0  ;;  %v856_v5 = vmul.f32 %v2148_v24, %v683_v1  ;;  %v1494_v6 = vpop.f32.mrb[6].mxu0  ;;  %v1510_v7 = vpop.f32.mrb[6].mxu1 }
 0x186   : > { %1432 = vst [vmem:[%s2174_s23 + $0x8] sm:$0xff] %v1360_v60   ;;  %1440 = vst [vmem:[%s2174_s23 + $0x48] sm:$0xff] %v1400_v61   ;;  %v881_v8 = vadd.f32 %v2150_v26, %v842_v62  ;;  %v897_v9 = vadd.f32 %v2150_v26, %v858_v63  ;;  %v843_v10 = vmul.f32 %v1494_v6, %v2148_v24  ;;  %v622_v12 = vpop.f32.mrb[7].mxu0  ;;  %v686_v13 = vpop.f32.mrb[7].mxu1 }
 0x187   : > { %v859_v11 = vmul.f32 %v1510_v7, %v2148_v24  ;;  %1356 = vst [vmem:[%s2174_s23] sm:$0xff] %v1355_v2   ;;  %1439 = vst [vmem:[%s2174_s23 + $0x40] sm:$0xff] %v1395_v3   ;;  %v879_v14 = vadd.f32 %v2150_v26, %v840_v4  ;;  %v895_v15 = vadd.f32 %v2150_v26, %v856_v5 }
 0x188   : > { %v841_v16 = vmul.f32 %v2148_v24, %v622_v12  ;;  %v857_v17 = vmul.f32 %v2148_v24, %v686_v13  ;;  %v882_v18 = vadd.f32 %v2150_v26, %v843_v10  ;;  %v913_v22 = vmax.f32 %v881_v8, 0.0 }
 0x189   : > { %v898_v19 = vadd.f32 %v2150_v26, %v859_v11  ;;  %v929_v23 = vmax.f32 %v897_v9, 0.0  ;;  %v911_v28 = vmax.f32 %v879_v14, 0.0  ;;  %v927_v29 = vmax.f32 %v895_v15, 0.0 }
 0x18a   : > { %v880_v20 = vadd.f32 %v2150_v26, %v841_v16  ;;  %v896_v21 = vadd.f32 %v2150_v26, %v857_v17  ;;  %v914_v25 = vmax.f32 %v882_v18, 0.0 }
 0x18b   : > { %v930_v27 = vmax.f32 %v898_v19, 0.0  ;;  %v1497_v32 = vpop.f32.mrb[8].mxu0  ;;  %v1513_v33 = vpop.f32.mrb[8].mxu1 }
 0x18c   : > { %v912_v30 = vmax.f32 %v880_v20, 0.0  ;;  %v928_v31 = vmax.f32 %v896_v21, 0.0  ;;  %v1370_v34 = vpack.c.bf16 %v914_v25, %v913_v22  ;;  %v846_v36 = vmul.f32 %v1497_v32, %v2148_v24  ;;  %v635_v38 = vpop.f32.mrb[9].mxu0  ;;  %v699_v39 = vpop.f32.mrb[9].mxu1 }
 0x18d   : > { %v1410_v35 = vpack.c.bf16 %v930_v27, %v929_v23  ;;  %v862_v37 = vmul.f32 %v1513_v33, %v2148_v24  ;;  %v844_v42 = vmul.f32 %v2148_v24, %v635_v38  ;;  %v860_v43 = vmul.f32 %v2148_v24, %v699_v39  ;;  %v1498_v44 = vpop.f32.mrb[10].mxu0  ;;  %v1514_v45 = vpop.f32.mrb[10].mxu1 }
 0x18e   : > { %v1365_v40 = vpack.c.bf16 %v912_v30, %v911_v28  ;;  %v1405_v41 = vpack.c.bf16 %v928_v31, %v927_v29  ;;  %1434 = vst [vmem:[%s2174_s23 + $0x18] sm:$0xff] %v1370_v34   ;;  %v885_v46 = vadd.f32 %v2150_v26, %v846_v36  ;;  %v847_v48 = vmul.f32 %v1498_v44, %v2148_v24  ;;  %v638_v50 = vpop.f32.mrb[11].mxu0  ;;  %v702_v51 = vpop.f32.mrb[11].mxu1 }
 0x18f   : > { %1442 = vst [vmem:[%s2174_s23 + $0x58] sm:$0xff] %v1410_v35   ;;  %v901_v47 = vadd.f32 %v2150_v26, %v862_v37  ;;  %v863_v49 = vmul.f32 %v1514_v45, %v2148_v24  ;;  %v883_v52 = vadd.f32 %v2150_v26, %v844_v42  ;;  %v899_v53 = vadd.f32 %v2150_v26, %v860_v43 }
 0x190   : > { %1433 = vst [vmem:[%s2174_s23 + $0x10] sm:$0xff] %v1365_v40   ;;  %1441 = vst [vmem:[%s2174_s23 + $0x50] sm:$0xff] %v1405_v41   ;;  %v845_v54 = vmul.f32 %v2148_v24, %v638_v50  ;;  %v861_v55 = vmul.f32 %v2148_v24, %v702_v51  ;;  %v886_v56 = vadd.f32 %v2150_v26, %v847_v48  ;;  %v917_v60 = vmax.f32 %v885_v46, 0.0 }
 0x191   : > { %v902_v57 = vadd.f32 %v2150_v26, %v863_v49  ;;  %v933_v61 = vmax.f32 %v901_v47, 0.0  ;;  %v915_v0 = vmax.f32 %v883_v52, 0.0  ;;  %v931_v1 = vmax.f32 %v899_v53, 0.0 }
 0x192   : > { %v884_v58 = vadd.f32 %v2150_v26, %v845_v54  ;;  %v900_v59 = vadd.f32 %v2150_v26, %v861_v55  ;;  %v918_v62 = vmax.f32 %v886_v56, 0.0 }
 0x193   : > { %v934_v63 = vmax.f32 %v902_v57, 0.0  ;;  %v1501_v4 = vpop.f32.mrb[12].mxu0  ;;  %v1517_v5 = vpop.f32.mrb[12].mxu1 }
 0x194   : > { %v916_v2 = vmax.f32 %v884_v58, 0.0  ;;  %v932_v3 = vmax.f32 %v900_v59, 0.0  ;;  %v1380_v6 = vpack.c.bf16 %v918_v62, %v917_v60  ;;  %v850_v8 = vmul.f32 %v1501_v4, %v2148_v24  ;;  %v651_v10 = vpop.f32.mrb[13].mxu0  ;;  %v715_v11 = vpop.f32.mrb[13].mxu1 }
 0x195   : > { %v1420_v7 = vpack.c.bf16 %v934_v63, %v933_v61  ;;  %v866_v9 = vmul.f32 %v1517_v5, %v2148_v24  ;;  %v848_v14 = vmul.f32 %v2148_v24, %v651_v10  ;;  %v864_v15 = vmul.f32 %v2148_v24, %v715_v11  ;;  %v1502_v16 = vpop.f32.mrb[14].mxu0  ;;  %v1518_v17 = vpop.f32.mrb[14].mxu1 }
 0x196   : > { %v1375_v12 = vpack.c.bf16 %v916_v2, %v915_v0  ;;  %v1415_v13 = vpack.c.bf16 %v932_v3, %v931_v1  ;;  %1436 = vst [vmem:[%s2174_s23 + $0x28] sm:$0xff] %v1380_v6   ;;  %v889_v18 = vadd.f32 %v2150_v26, %v850_v8  ;;  %v851_v20 = vmul.f32 %v1502_v16, %v2148_v24  ;;  %v654_v22 = vpop.f32.mrb[15].mxu0  ;;  %v718_v23 = vpop.f32.mrb[15].mxu1 }
 0x197   : > { %1444 = vst [vmem:[%s2174_s23 + $0x68] sm:$0xff] %v1420_v7   ;;  %v905_v19 = vadd.f32 %v2150_v26, %v866_v9  ;;  %v867_v21 = vmul.f32 %v1518_v17, %v2148_v24  ;;  %v887_v25 = vadd.f32 %v2150_v26, %v848_v14  ;;  %v903_v27 = vadd.f32 %v2150_v26, %v864_v15 }
 0x198   : > { %1435 = vst [vmem:[%s2174_s23 + $0x20] sm:$0xff] %v1375_v12   ;;  %1443 = vst [vmem:[%s2174_s23 + $0x60] sm:$0xff] %v1415_v13   ;;  %v849_v28 = vmul.f32 %v2148_v24, %v654_v22  ;;  %v865_v29 = vmul.f32 %v2148_v24, %v718_v23  ;;  %v890_v30 = vadd.f32 %v2150_v26, %v851_v20  ;;  %v921_v34 = vmax.f32 %v889_v18, 0.0 }
 0x199   : > { %v906_v31 = vadd.f32 %v2150_v26, %v867_v21  ;;  %v937_v35 = vmax.f32 %v905_v19, 0.0  ;;  %v919_v24 = vmax.f32 %v887_v25, 0.0  ;;  %v935_v38 = vmax.f32 %v903_v27, 0.0 }
 0x19a   : > { %v888_v32 = vadd.f32 %v2150_v26, %v849_v28  ;;  %v904_v33 = vadd.f32 %v2150_v26, %v865_v29  ;;  %v922_v36 = vmax.f32 %v890_v30, 0.0 }
 0x19b   : > { %v938_v37 = vmax.f32 %v906_v31, 0.0 }
 0x19c   : > { %v920_v39 = vmax.f32 %v888_v32, 0.0  ;;  %v936_v40 = vmax.f32 %v904_v33, 0.0  ;;  %v1390_v41 = vpack.c.bf16 %v922_v36, %v921_v34 }
 0x19d   : > { %v1430_v42 = vpack.c.bf16 %v938_v37, %v937_v35 }
 0x19e   : > { %v1385_v26 = vpack.c.bf16 %v920_v39, %v919_v24  ;;  %v1425_v43 = vpack.c.bf16 %v936_v40, %v935_v38  ;;  %1438 = vst [vmem:[%s2174_s23 + $0x38] sm:$0xff] %v1390_v41  }
 0x19f   : > { %1446 = vst [vmem:[%s2174_s23 + $0x78] sm:$0xff] %v1430_v42  }
 0x1a0   : > { %1437 = vst [vmem:[%s2174_s23 + $0x30] sm:$0xff] %v1385_v26   ;;  %1445 = vst [vmem:[%s2174_s23 + $0x70] sm:$0xff] %v1425_v43  }
 0x1a1   : > { %1783 = shalt.err (!%p1780_p0)
}
 0x1a2   : > { %s1784_s9 = scalar_lea.hbm %s2237_s18, 2048  ;;  %s1788_s21 = scalar_lea.hbm %s2296_s4, 4096 }
 0x1a3   : > { %p1785_p4 = scmp.ne.s32.totalorder %s2237_s18, %s1784_s9  ;;  %p1789_p12 = scmp.lt.u32.totalorder %s2237_s18, %s2296_s4 }
 0x1a4   : > { %p1790_p1 = scmp.lt.u32.totalorder %s1788_s21, %s1784_s9  ;;  %p1792_p13 = scmp.lt.u32.totalorder %s1784_s9, %s2237_s18 }
 0x1a5   : > { %p1786_p2 = pnand %p1785_p4, %p2051_p10 }
 0x1a6   : > { %p1791_p11 = por %p1790_p1, %p1789_p12 }
 0x1a7   : > { %p1787_p8 = pneg %p1786_p2 }
 0x1a8   : > { %p1793_p6 = por %p1792_p13, %p1791_p11 }
 0x1aa   : > { %p1794_p3 = pnand %p1793_p6, %p1787_p8 }
 0x1ac   : > { %1797 = shalt.err (!%p1794_p3)
}
 0x1ad   : > { %s1869_s23 = smov 64   ;;  %s1870_s25 = smov 4  }
 0x1ae   : > { %1549 = dma.vmem_to_hbm [thread:$0]  (%p2051_p10), %s2239_s27, 2048, %s2237_s18, %s1100_s24, %s1869_s23, %s1869_s23, %s1870_s25  }
 0x1af PF: > { %s2316_s5 = sld [smem:[#allocation16_spill]]  ;;  %s1129_s7 = sand.u32 1, %s1840_s15  }
 0x1b0   : > { %p2318_p7 = scmp.ge.s32.totalorder %s1860_s20, 2  ;;  %s1130_s6 = scalar_lea.sflag [#allocation5], %s1129_s7 }
 0x1b5   : > { %p2317_p5 = scmp.ne.s32.totalorder %s2316_s5, 0 }
 0x1b7   : > { %p1566_p9 = pnand %p2318_p7, %p2317_p5 }
 0x1b9   : > { %1835 = dma.done.wait (!%p1566_p9), %s1130_s6, 2048  }
 0x1ba   : > { %1837 = vsyncadd (!%p1566_p9), %s1130_s6, 4294965248  ;;  %s22_s20 = sadd.s32 1, %s1860_s20   ;;  %s2319_s15 = smov %s1844_s16 }
 0x1bb   : > { %p19_p0 = scmp.ge.s32.totalorder %s22_s20, 4   ;;  %s2320_s16 = smov %s1848_s17 }
 0x1bc   : > { %s2321_s17 = smov %s2063_s22  ;;  %s2322_s18 = smov %s1856_s19 }
 0x1bd   : > { %s2323_s19 = smov %s2325_s11  ;;  %21 = sbr.rel (!%p19_p0) target bundleno = 8 (0x8), region = 104 }
 0x1c4   :  { %1135 = vsyncpa [#allocation4], 1 }
 0x1c5   :  { %1137 = vsyncpa [#allocation4 + $0x1], 1 }
 0x1c6   :  { %1138 = vsyncpa [#allocation7], 1 }
 0x1c7   :  { %1139 = vsyncpa [#allocation10], 1 }
 0x1c8   :  { %1140 = vsyncpa [#allocation5], 1 }
 0x1c9   :  { %1142 = vsyncpa [#allocation5 + $0x1], 1 }

</bundles_post_ra>
